<compile_context>
chip_gen: v6e
topology: v6e:2x2x1
jax: 0.10.0
libtpu: 0.0.40
codegen_flags: <defaults>
</compile_context>

<pallas_src>
import functools

import jax
import jax.numpy as jnp
from jax.experimental import pallas as pl
from jax.experimental.pallas import tpu as pltpu


# ------------------------------ fused Pallas kernel ------------------------------

def _decoder_block_kernel(x_ref, w1_ref, b1_ref, w2_ref, b2_ref, wu_ref, bu_ref,
                          o_ref, xp2_ref, *, NB, H, W, C):
    # x_ref : (NB*(H+2), W*Cin)  f32   NB row-padded images stacked along rows (host pad)
    # w1_ref: (3, W*Cin, W*C)    bf16  conv1 banded row-Toeplitz weight (W zero-pad folded in)
    # b1_ref: (1, W*C)           f32   conv1 bias tiled over w
    # w2_ref: (3, W*C, W*C)      bf16  conv2 banded row-Toeplitz weight
    # b2_ref: (1, W*C)           f32
    # wu_ref: (W*C, 4*W*C)       bf16  upconv block-diag weight, both row parities fused on lanes
    # bu_ref: (1, 4*W*C)         f32
    # o_ref : (NB, H, 4*W*C)     f32   row-major identical to (NB, 2H, 2W, C)
    # xp2_ref: VMEM (NB*(H+2), W*C) f32  row-padded h1 slab (conv2 input)
    Hp = H + 2
    M = NB * Hp - 2          # rows fed to every shifted matmul (all NB images + frame slack)
    WC = W * C

    # ---------------- conv1: 3x3, pad=1, bias, ReLU ----------------
    # acc1[r] = conv1 output centered at padded row r+1; image n row h lives at r = n*Hp + h.
    acc1 = jnp.zeros((M, WC), jnp.float32)
    for ki in range(3):
        acc1 += jnp.dot(x_ref[ki:ki + M, :].astype(jnp.bfloat16), w1_ref[ki],
                        preferred_element_type=jnp.float32)
    h1 = jnp.maximum(acc1 + b1_ref[...], 0.0)                    # (M, W*C) f32

    # ---------------- h1 -> row-padded slab for conv2 ----------------
    # Only the 2 halo rows per image are (re)zeroed; interiors are fully overwritten.
    zrow = jnp.zeros((1, WC), jnp.float32)
    for n in range(NB):
        xp2_ref[n * Hp: n * Hp + 1, :] = zrow                           # top halo
        xp2_ref[n * Hp + 1: n * Hp + 1 + H, :] = h1[n * Hp: n * Hp + H]  # interior
        xp2_ref[n * Hp + H + 1: n * Hp + H + 2, :] = zrow               # bottom halo

    # ---------------- conv2: 3x3, pad=1, bias, ReLU ----------------
    acc2 = jnp.zeros((M, WC), jnp.float32)
    for ki in range(3):
        acc2 += jnp.dot(xp2_ref[ki:ki + M, :].astype(jnp.bfloat16), w2_ref[ki],
                        preferred_element_type=jnp.float32)
    h2 = jnp.maximum(acc2 + b2_ref[...], 0.0)                    # (M, W*C) f32

    # ------ ConvTranspose2d(k=2, s=2): ONE matmul, both row parities fused on lanes ------
    # y[r, di*(2W*C) + (2w+dj)*C + co] = out[2r+di, 2w+dj, co]
    y = jnp.dot(h2.astype(jnp.bfloat16), wu_ref[...],
                preferred_element_type=jnp.float32) + bu_ref[...]   # (M, 4*W*C) f32
    for n in range(NB):
        o_ref[n] = y[n * Hp: n * Hp + H]                         # unmasked (H, 4*W*C) store


# ------------------ weight re-packing (host side, done ONCE per param set) ------------------

def _conv_row_toeplitz(w_oihw, W):
    """(Cout, Cin, 3, 3) -> (3, W*Cin, W*Cout) banded Toeplitz matrices (one per kernel row).

    W-direction zero padding is folded in (boundary taps zeroed), so the kernel only needs
    a ROW-padded LHS slab:  conv_out[h, w, co] = sum_ki ( xrowpad[h+ki, :] @ T[ki] )[w*Cout+co].
    """
    Cout, Cin, KH, KW = w_oihw.shape
    wk = jnp.transpose(w_oihw, (2, 3, 1, 0)).astype(jnp.float32)        # (KH, KW, Cin, Cout)
    p = jnp.arange(W)[:, None, None]                                    # input column
    w = jnp.arange(W)[None, :, None]                                    # output column
    k = jnp.arange(KW)[None, None, :]                                   # kernel tap
    sel = (p == w + k - (KW // 2)).astype(jnp.float32)                  # (W, W, KW)
    T = jnp.einsum("pwk,jkco->jpcwo", sel, wk)                          # (KH, W, Cin, W, Cout)
    return T.reshape(KH, W * Cin, W * Cout)


def _upconv_fused(wt_iokk, W):
    """(Cin, Cout, 2, 2) -> (W*Cin, 4*W*Cout) block-diagonal weight with BOTH row parities fused.

    Column order di*(2*W*Cout) + (2v+dj)*Cout + co, so a single matmul per image row emits
    output rows 2h and 2h+1 interleaved and lane-dense.
    """
    Ci, Co, KH, KW = wt_iokk.shape          # PyTorch ConvTranspose2d weight: (in, out, kH, kW)
    eye = jnp.eye(W, dtype=jnp.float32)
    U = jnp.einsum("wv,coij->wcivjo", eye, wt_iokk.astype(jnp.float32))  # (W,Ci,KH,W,KW,Co)
    return U.reshape(W * Ci, KH * W * KW * Co)


def pack_decoder_params(params, W):
    """Repack PyTorch-layout weights for the kernel.  Hoisted out of the per-forward path."""
    C = params["w1"].shape[0]
    return {
        "w1": _conv_row_toeplitz(params["w1"], W).astype(jnp.bfloat16),   # (3, W*Cin, W*C)
        "w2": _conv_row_toeplitz(params["w2"], W).astype(jnp.bfloat16),   # (3, W*C,  W*C)
        "wu": _upconv_fused(params["wt"], W).astype(jnp.bfloat16),        # (W*C, 4*W*C)
        "b1": jnp.tile(params["b1"].astype(jnp.float32), (W,)).reshape(1, W * C),
        "b2": jnp.tile(params["b2"].astype(jnp.float32), (W,)).reshape(1, W * C),
        "bu": jnp.tile(params["bt"].astype(jnp.float32), (4 * W,)).reshape(1, 4 * W * C),
    }


# ------------------------------ wrapper ------------------------------

def decoder_block_forward(x_nchw, packed, *, block_batch=None):
    """DecoderBlock (first=False, batch_norm=False) forward: DoubleConv -> ConvTranspose2d(2,2)."""
    N, Cin, H, W = x_nchw.shape
    WC = packed["b1"].shape[1]
    C = WC // W
    Hp = H + 2
    NB = N if block_batch is None else block_batch          # images per grid step (M-batching)
    assert N % NB == 0, "batch must be divisible by block_batch"
    # (8,128) rule on the stacked-row input block when the grid has >1 step:
    assert NB == N or (NB * Hp) % 8 == 0, "NB*(H+2) must be a multiple of 8 when grid > 1"

    # NCHW -> lane-dense (N, H, W*Cin), 1 zero halo row above/below each image, stack rows.
    x = jnp.transpose(x_nchw, (0, 2, 3, 1)).reshape(N, H, W * Cin).astype(jnp.float32)
    x = jnp.pad(x, ((0, 0), (1, 1), (0, 0))).reshape(N * Hp, W * Cin)

    kernel = functools.partial(_decoder_block_kernel, NB=NB, H=H, W=W, C=C)

    y = pl.pallas_call(
        kernel,
        out_shape=jax.ShapeDtypeStruct((N, H, 4 * WC), jnp.float32),
        grid=(N // NB,),
        in_specs=[
            pl.BlockSpec((NB * Hp, W * Cin), lambda g: (g, 0)),
            pl.BlockSpec((3, W * Cin, WC), lambda g: (0, 0, 0)),
            pl.BlockSpec((1, WC), lambda g: (0, 0)),
            pl.BlockSpec((3, WC, WC), lambda g: (0, 0, 0)),
            pl.BlockSpec((1, WC), lambda g: (0, 0)),
            pl.BlockSpec((WC, 4 * WC), lambda g: (0, 0)),
            pl.BlockSpec((1, 4 * WC), lambda g: (0, 0)),
        ],
        out_specs=pl.BlockSpec((NB, H, 4 * WC), lambda g: (g, 0, 0)),
        scratch_shapes=[
            pltpu.VMEM((NB * Hp, WC), jnp.float32),      # row-padded h1 slab
        ],
        compiler_params=pltpu.CompilerParams(dimension_semantics=("parallel",)),
    )(x, packed["w1"], packed["b1"], packed["w2"], packed["b2"], packed["wu"], packed["bu"])

    # (N, H, 4*W*C) is row-major identical to (N, 2H, 2W, C): free metadata reshape, then a
    # single NHWC -> NCHW transpose to match the PyTorch output layout.
    y = y.reshape(N, 2 * H, 2 * W, C)
    return jnp.transpose(y, (0, 3, 1, 2))


# ------------------------------ pure-JAX f32 reference ------------------------------

def _ref_forward(x_nchw, params):
    x = jnp.transpose(x_nchw, (0, 2, 3, 1))

    def conv_ref(x, w_oihw, b):
        y = jax.lax.conv_general_dilated(
            x, jnp.transpose(w_oihw, (2, 3, 1, 0)),
            window_strides=(1, 1), padding=((1, 1), (1, 1)),
            dimension_numbers=("NHWC", "HWIO", "NHWC"))
        return jax.nn.relu(y + b.reshape(1, 1, 1, -1))

    h = conv_ref(x, params["w1"], params["b1"])
    h = conv_ref(h, params["w2"], params["b2"])
    N, H, W, _ = h.shape
    Cout = params["wt"].shape[1]
    t = jnp.einsum("nhwc,cokl->nhkwlo", h, params["wt"])
    y = t.reshape(N, 2 * H, 2 * W, Cout) + params["bt"].reshape(1, 1, 1, -1)
    return jnp.transpose(y, (0, 3, 1, 2))


# ---------------------------------- main ----------------------------------

if __name__ == "__main__":
    N, Cin, Cout, H, W = 2, 4, 8, 16, 16
    key = jax.random.PRNGKey(0)
    ks = jax.random.split(key, 7)

    x = jax.random.normal(ks[0], (N, Cin, H, W), jnp.float32)   # NCHW, like PyTorch
    params = {
        "w1": 0.1 * jax.random.normal(ks[1], (Cout, Cin, 3, 3), jnp.float32),
        "b1": 0.1 * jax.random.normal(ks[2], (Cout,), jnp.float32),
        "w2": 0.1 * jax.random.normal(ks[3], (Cout, Cout, 3, 3), jnp.float32),
        "b2": 0.1 * jax.random.normal(ks[4], (Cout,), jnp.float32),
        # PyTorch ConvTranspose2d weight layout: (in_channels, out_channels, kH, kW);
        # in DecoderBlock both are `out_channels`, so Cin == Cout here by construction.
        "wt": 0.1 * jax.random.normal(ks[5], (Cout, Cout, 2, 2), jnp.float32),
        "bt": 0.1 * jax.random.normal(ks[6], (Cout,), jnp.float32),
    }

    packed = pack_decoder_params(params, W)     # repacking hoisted out of the forward path
    # NB = N -> one grid step (best on v5e/v6e: 1 TC); on v7x use block_batch=N//2.
    fwd = jax.jit(functools.partial(decoder_block_forward, block_batch=N))

    out = jax.block_until_ready(fwd(x, packed))
    assert out.shape == (N, Cout, 2 * H, 2 * W), out.shape

    ref = jax.block_until_ready(_ref_forward(x, params))
    # matmuls run in bf16 on the MXU (f32 accumulation), so compare with a bf16-level tolerance
    assert jnp.allclose(out, ref, atol=2e-2, rtol=2e-2), float(jnp.max(jnp.abs(out - ref)))

    print("KERNEL_OK")
</pallas_src>

<mosaic_0001>
module attributes {stable_mosaic.version = 11 : i64} {
  func.func @_decoder_block_kernel(%arg0: i32, %arg1: memref<36x64xf32, #tpu.memory_space<vmem>>, %arg2: memref<3x64x128xbf16, #tpu.memory_space<vmem>>, %arg3: memref<1x128xf32, #tpu.memory_space<vmem>>, %arg4: memref<3x128x128xbf16, #tpu.memory_space<vmem>>, %arg5: memref<1x128xf32, #tpu.memory_space<vmem>>, %arg6: memref<128x512xbf16, #tpu.memory_space<vmem>>, %arg7: memref<1x512xf32, #tpu.memory_space<vmem>>, %arg8: memref<2x16x512xf32, #tpu.memory_space<vmem>>, %arg9: memref<36x128xf32, #tpu.memory_space<vmem>>) attributes {dimension_semantics = [#tpu.dimension_semantics<parallel>], iteration_bounds = array<i64: 1>, scalar_prefetch = 0 : i64, scratch_operands = 1 : i64, tpu.core_type = #tpu.core_type<tc>, window_params = [{transform_indices = @transform_0, window_bounds = array<i64: 36, 64>}, {pipeline_mode = #tpu.pipeline_mode<synchronous>, transform_indices = @transform_1, window_bounds = array<i64: 3, 64, 128>}, {pipeline_mode = #tpu.pipeline_mode<synchronous>, transform_indices = @transform_2, window_bounds = array<i64: 1, 128>}, {pipeline_mode = #tpu.pipeline_mode<synchronous>, transform_indices = @transform_3, window_bounds = array<i64: 3, 128, 128>}, {pipeline_mode = #tpu.pipeline_mode<synchronous>, transform_indices = @transform_4, window_bounds = array<i64: 1, 128>}, {pipeline_mode = #tpu.pipeline_mode<synchronous>, transform_indices = @transform_5, window_bounds = array<i64: 128, 512>}, {pipeline_mode = #tpu.pipeline_mode<synchronous>, transform_indices = @transform_6, window_bounds = array<i64: 1, 512>}, {transform_indices = @transform_7, window_bounds = array<i64: 2, 16, 512>}]} {
    %cst = arith.constant 0.000000e+00 : f32
    %0 = vector.broadcast %cst : f32 to vector<34x128xf32>
    %c0 = arith.constant 0 : index
    %c0_0 = arith.constant 0 : index
    %1 = vector.load %arg1[%c0, %c0_0] : memref<36x64xf32, #tpu.memory_space<vmem>>, vector<34x64xf32>
    %2 = arith.truncf %1 : vector<34x64xf32> to vector<34x64xbf16>
    %c0_1 = arith.constant 0 : index
    %c0_2 = arith.constant 0 : index
    %c0_3 = arith.constant 0 : index
    %3 = vector.load %arg2[%c0_1, %c0_2, %c0_3] : memref<3x64x128xbf16, #tpu.memory_space<vmem>>, vector<1x64x128xbf16>
    %4 = vector.shape_cast %3 : vector<1x64x128xbf16> to vector<64x128xbf16>
    %cst_4 = arith.constant dense<0.000000e+00> : vector<34x128xf32>
    %5 = tpu.matmul %2, %4, %cst_4 {dimension_numbers = #tpu.dot_dimension_numbers<[1], [0], [0], [1], [0, 0, 1, 1], [], []>} : vector<34x64xbf16>, vector<64x128xbf16>, vector<34x128xf32> -> vector<34x128xf32>
    %6 = arith.addf %0, %5 : vector<34x128xf32>
    %c1 = arith.constant 1 : index
    %c0_5 = arith.constant 0 : index
    %7 = vector.load %arg1[%c1, %c0_5] : memref<36x64xf32, #tpu.memory_space<vmem>>, vector<34x64xf32>
    %8 = arith.truncf %7 : vector<34x64xf32> to vector<34x64xbf16>
    %c1_6 = arith.constant 1 : index
    %c0_7 = arith.constant 0 : index
    %c0_8 = arith.constant 0 : index
    %9 = vector.load %arg2[%c1_6, %c0_7, %c0_8] : memref<3x64x128xbf16, #tpu.memory_space<vmem>>, vector<1x64x128xbf16>
    %10 = vector.shape_cast %9 : vector<1x64x128xbf16> to vector<64x128xbf16>
    %cst_9 = arith.constant dense<0.000000e+00> : vector<34x128xf32>
    %11 = tpu.matmul %8, %10, %cst_9 {dimension_numbers = #tpu.dot_dimension_numbers<[1], [0], [0], [1], [0, 0, 1, 1], [], []>} : vector<34x64xbf16>, vector<64x128xbf16>, vector<34x128xf32> -> vector<34x128xf32>
    %12 = arith.addf %6, %11 : vector<34x128xf32>
    %c2 = arith.constant 2 : index
    %c0_10 = arith.constant 0 : index
    %13 = vector.load %arg1[%c2, %c0_10] : memref<36x64xf32, #tpu.memory_space<vmem>>, vector<34x64xf32>
    %14 = arith.truncf %13 : vector<34x64xf32> to vector<34x64xbf16>
    %c2_11 = arith.constant 2 : index
    %c0_12 = arith.constant 0 : index
    %c0_13 = arith.constant 0 : index
    %15 = vector.load %arg2[%c2_11, %c0_12, %c0_13] : memref<3x64x128xbf16, #tpu.memory_space<vmem>>, vector<1x64x128xbf16>
    %16 = vector.shape_cast %15 : vector<1x64x128xbf16> to vector<64x128xbf16>
    %cst_14 = arith.constant dense<0.000000e+00> : vector<34x128xf32>
    %17 = tpu.matmul %14, %16, %cst_14 {dimension_numbers = #tpu.dot_dimension_numbers<[1], [0], [0], [1], [0, 0, 1, 1], [], []>} : vector<34x64xbf16>, vector<64x128xbf16>, vector<34x128xf32> -> vector<34x128xf32>
    %18 = arith.addf %12, %17 : vector<34x128xf32>
    %c0_15 = arith.constant 0 : index
    %c0_16 = arith.constant 0 : index
    %19 = vector.load %arg3[%c0_15, %c0_16] : memref<1x128xf32, #tpu.memory_space<vmem>>, vector<1x128xf32>
    %20 = vector.broadcast %19 : vector<1x128xf32> to vector<34x128xf32>
    %21 = arith.addf %18, %20 : vector<34x128xf32>
    %cst_17 = arith.constant 0.000000e+00 : f32
    %22 = vector.broadcast %cst_17 : f32 to vector<34x128xf32>
    %23 = arith.maximumf %21, %22 : vector<34x128xf32>
    %cst_18 = arith.constant 0.000000e+00 : f32
    %24 = vector.broadcast %cst_18 : f32 to vector<1x128xf32>
    %c0_19 = arith.constant 0 : index
    %c0_20 = arith.constant 0 : index
    %25 = vector.load %arg9[%c0_19, %c0_20] : memref<36x128xf32, #tpu.memory_space<vmem>>, vector<1x128xf32>
    tpu.vector_store %arg9[%c0_19, %c0_20], %24 {strides = array<i32>} : memref<36x128xf32, #tpu.memory_space<vmem>>, vector<1x128xf32>,
    %26 = vector.extract_strided_slice %23 {offsets = [0, 0], sizes = [16, 128], strides = [1, 1]} : vector<34x128xf32> to vector<16x128xf32>
    %c1_21 = arith.constant 1 : index
    %c0_22 = arith.constant 0 : index
    %27 = vector.load %arg9[%c1_21, %c0_22] : memref<36x128xf32, #tpu.memory_space<vmem>>, vector<16x128xf32>
    tpu.vector_store %arg9[%c1_21, %c0_22], %26 {strides = array<i32>} : memref<36x128xf32, #tpu.memory_space<vmem>>, vector<16x128xf32>,
    %c17 = arith.constant 17 : index
    %c0_23 = arith.constant 0 : index
    %28 = vector.load %arg9[%c17, %c0_23] : memref<36x128xf32, #tpu.memory_space<vmem>>, vector<1x128xf32>
    tpu.vector_store %arg9[%c17, %c0_23], %24 {strides = array<i32>} : memref<36x128xf32, #tpu.memory_space<vmem>>, vector<1x128xf32>,
    %c18 = arith.constant 18 : index
    %c0_24 = arith.constant 0 : index
    %29 = vector.load %arg9[%c18, %c0_24] : memref<36x128xf32, #tpu.memory_space<vmem>>, vector<1x128xf32>
    tpu.vector_store %arg9[%c18, %c0_24], %24 {strides = array<i32>} : memref<36x128xf32, #tpu.memory_space<vmem>>, vector<1x128xf32>,
    %30 = vector.extract_strided_slice %23 {offsets = [18, 0], sizes = [16, 128], strides = [1, 1]} : vector<34x128xf32> to vector<16x128xf32>
    %c19 = arith.constant 19 : index
    %c0_25 = arith.constant 0 : index
    %31 = vector.load %arg9[%c19, %c0_25] : memref<36x128xf32, #tpu.memory_space<vmem>>, vector<16x128xf32>
    tpu.vector_store %arg9[%c19, %c0_25], %30 {strides = array<i32>} : memref<36x128xf32, #tpu.memory_space<vmem>>, vector<16x128xf32>,
    %c35 = arith.constant 35 : index
    %c0_26 = arith.constant 0 : index
    %32 = vector.load %arg9[%c35, %c0_26] : memref<36x128xf32, #tpu.memory_space<vmem>>, vector<1x128xf32>
    tpu.vector_store %arg9[%c35, %c0_26], %24 {strides = array<i32>} : memref<36x128xf32, #tpu.memory_space<vmem>>, vector<1x128xf32>,
    %cst_27 = arith.constant 0.000000e+00 : f32
    %33 = vector.broadcast %cst_27 : f32 to vector<34x128xf32>
    %c0_28 = arith.constant 0 : index
    %c0_29 = arith.constant 0 : index
    %34 = vector.load %arg9[%c0_28, %c0_29] : memref<36x128xf32, #tpu.memory_space<vmem>>, vector<34x128xf32>
    %35 = arith.truncf %34 : vector<34x128xf32> to vector<34x128xbf16>
    %c0_30 = arith.constant 0 : index
    %c0_31 = arith.constant 0 : index
    %c0_32 = arith.constant 0 : index
    %36 = vector.load %arg4[%c0_30, %c0_31, %c0_32] : memref<3x128x128xbf16, #tpu.memory_space<vmem>>, vector<1x128x128xbf16>
    %37 = vector.shape_cast %36 : vector<1x128x128xbf16> to vector<128x128xbf16>
    %cst_33 = arith.constant dense<0.000000e+00> : vector<34x128xf32>
    %38 = tpu.matmul %35, %37, %cst_33 {dimension_numbers = #tpu.dot_dimension_numbers<[1], [0], [0], [1], [0, 0, 1, 1], [], []>} : vector<34x128xbf16>, vector<128x128xbf16>, vector<34x128xf32> -> vector<34x128xf32>
    %39 = arith.addf %33, %38 : vector<34x128xf32>
    %c1_34 = arith.constant 1 : index
    %c0_35 = arith.constant 0 : index
    %40 = vector.load %arg9[%c1_34, %c0_35] : memref<36x128xf32, #tpu.memory_space<vmem>>, vector<34x128xf32>
    %41 = arith.truncf %40 : vector<34x128xf32> to vector<34x128xbf16>
    %c1_36 = arith.constant 1 : index
    %c0_37 = arith.constant 0 : index
    %c0_38 = arith.constant 0 : index
    %42 = vector.load %arg4[%c1_36, %c0_37, %c0_38] : memref<3x128x128xbf16, #tpu.memory_space<vmem>>, vector<1x128x128xbf16>
    %43 = vector.shape_cast %42 : vector<1x128x128xbf16> to vector<128x128xbf16>
    %cst_39 = arith.constant dense<0.000000e+00> : vector<34x128xf32>
    %44 = tpu.matmul %41, %43, %cst_39 {dimension_numbers = #tpu.dot_dimension_numbers<[1], [0], [0], [1], [0, 0, 1, 1], [], []>} : vector<34x128xbf16>, vector<128x128xbf16>, vector<34x128xf32> -> vector<34x128xf32>
    %45 = arith.addf %39, %44 : vector<34x128xf32>
    %c2_40 = arith.constant 2 : index
    %c0_41 = arith.constant 0 : index
    %46 = vector.load %arg9[%c2_40, %c0_41] : memref<36x128xf32, #tpu.memory_space<vmem>>, vector<34x128xf32>
    %47 = arith.truncf %46 : vector<34x128xf32> to vector<34x128xbf16>
    %c2_42 = arith.constant 2 : index
    %c0_43 = arith.constant 0 : index
    %c0_44 = arith.constant 0 : index
    %48 = vector.load %arg4[%c2_42, %c0_43, %c0_44] : memref<3x128x128xbf16, #tpu.memory_space<vmem>>, vector<1x128x128xbf16>
    %49 = vector.shape_cast %48 : vector<1x128x128xbf16> to vector<128x128xbf16>
    %cst_45 = arith.constant dense<0.000000e+00> : vector<34x128xf32>
    %50 = tpu.matmul %47, %49, %cst_45 {dimension_numbers = #tpu.dot_dimension_numbers<[1], [0], [0], [1], [0, 0, 1, 1], [], []>} : vector<34x128xbf16>, vector<128x128xbf16>, vector<34x128xf32> -> vector<34x128xf32>
    %51 = arith.addf %45, %50 : vector<34x128xf32>
    %c0_46 = arith.constant 0 : index
    %c0_47 = arith.constant 0 : index
    %52 = vector.load %arg5[%c0_46, %c0_47] : memref<1x128xf32, #tpu.memory_space<vmem>>, vector<1x128xf32>
    %53 = vector.broadcast %52 : vector<1x128xf32> to vector<34x128xf32>
    %54 = arith.addf %51, %53 : vector<34x128xf32>
    %cst_48 = arith.constant 0.000000e+00 : f32
    %55 = vector.broadcast %cst_48 : f32 to vector<34x128xf32>
    %56 = arith.maximumf %54, %55 : vector<34x128xf32>
    %57 = arith.truncf %56 : vector<34x128xf32> to vector<34x128xbf16>
    %c0_49 = arith.constant 0 : index
    %c0_50 = arith.constant 0 : index
    %58 = vector.load %arg6[%c0_49, %c0_50] : memref<128x512xbf16, #tpu.memory_space<vmem>>, vector<128x512xbf16>
    %cst_51 = arith.constant dense<0.000000e+00> : vector<34x512xf32>
    %59 = tpu.matmul %57, %58, %cst_51 {dimension_numbers = #tpu.dot_dimension_numbers<[1], [0], [0], [1], [0, 0, 1, 1], [], []>} : vector<34x128xbf16>, vector<128x512xbf16>, vector<34x512xf32> -> vector<34x512xf32>
    %c0_52 = arith.constant 0 : index
    %c0_53 = arith.constant 0 : index
    %60 = vector.load %arg7[%c0_52, %c0_53] : memref<1x512xf32, #tpu.memory_space<vmem>>, vector<1x512xf32>
    %61 = vector.broadcast %60 : vector<1x512xf32> to vector<34x512xf32>
    %62 = arith.addf %59, %61 : vector<34x512xf32>
    %63 = vector.extract_strided_slice %62 {offsets = [0, 0], sizes = [16, 512], strides = [1, 1]} : vector<34x512xf32> to vector<16x512xf32>
    %c0_54 = arith.constant 0 : index
    %c0_55 = arith.constant 0 : index
    %c0_56 = arith.constant 0 : index
    %64 = vector.load %arg8[%c0_54, %c0_55, %c0_56] : memref<2x16x512xf32, #tpu.memory_space<vmem>>, vector<1x16x512xf32>
    %65 = vector.shape_cast %64 : vector<1x16x512xf32> to vector<16x512xf32>
    %66 = vector.shape_cast %63 : vector<16x512xf32> to vector<1x16x512xf32>
    tpu.vector_store %arg8[%c0_54, %c0_55, %c0_56], %66 {strides = array<i32>} : memref<2x16x512xf32, #tpu.memory_space<vmem>>, vector<1x16x512xf32>,
    %67 = vector.extract_strided_slice %62 {offsets = [18, 0], sizes = [16, 512], strides = [1, 1]} : vector<34x512xf32> to vector<16x512xf32>
    %c1_57 = arith.constant 1 : index
    %c0_58 = arith.constant 0 : index
    %c0_59 = arith.constant 0 : index
    %68 = vector.load %arg8[%c1_57, %c0_58, %c0_59] : memref<2x16x512xf32, #tpu.memory_space<vmem>>, vector<1x16x512xf32>
    %69 = vector.shape_cast %68 : vector<1x16x512xf32> to vector<16x512xf32>
    %70 = vector.shape_cast %67 : vector<16x512xf32> to vector<1x16x512xf32>
    tpu.vector_store %arg8[%c1_57, %c0_58, %c0_59], %70 {strides = array<i32>} : memref<2x16x512xf32, #tpu.memory_space<vmem>>, vector<1x16x512xf32>,
    return
  }
  func.func @transform_0(%arg0: i32) -> (i32, i32) {
    %c0_i32 = arith.constant 0 : i32
    %c0_i32_0 = arith.constant 0 : i32
    return %arg0, %c0_i32 : i32, i32
  }
  func.func @transform_1(%arg0: i32) -> (i32, i32, i32) {
    %c0_i32 = arith.constant 0 : i32
    %c0_i32_0 = arith.constant 0 : i32
    %c0_i32_1 = arith.constant 0 : i32
    %c0_i32_2 = arith.constant 0 : i32
    return %c0_i32, %c0_i32_0, %c0_i32_1 : i32, i32, i32
  }
  func.func @transform_2(%arg0: i32) -> (i32, i32) {
    %c0_i32 = arith.constant 0 : i32
    %c0_i32_0 = arith.constant 0 : i32
    %c0_i32_1 = arith.constant 0 : i32
    return %c0_i32, %c0_i32_0 : i32, i32
  }
  func.func @transform_3(%arg0: i32) -> (i32, i32, i32) {
    %c0_i32 = arith.constant 0 : i32
    %c0_i32_0 = arith.constant 0 : i32
    %c0_i32_1 = arith.constant 0 : i32
    %c0_i32_2 = arith.constant 0 : i32
    return %c0_i32, %c0_i32_0, %c0_i32_1 : i32, i32, i32
  }
  func.func @transform_4(%arg0: i32) -> (i32, i32) {
    %c0_i32 = arith.constant 0 : i32
    %c0_i32_0 = arith.constant 0 : i32
    %c0_i32_1 = arith.constant 0 : i32
    return %c0_i32, %c0_i32_0 : i32, i32
  }
  func.func @transform_5(%arg0: i32) -> (i32, i32) {
    %c0_i32 = arith.constant 0 : i32
    %c0_i32_0 = arith.constant 0 : i32
    %c0_i32_1 = arith.constant 0 : i32
    return %c0_i32, %c0_i32_0 : i32, i32
  }
  func.func @transform_6(%arg0: i32) -> (i32, i32) {
    %c0_i32 = arith.constant 0 : i32
    %c0_i32_0 = arith.constant 0 : i32
    %c0_i32_1 = arith.constant 0 : i32
    return %c0_i32, %c0_i32_0 : i32, i32
  }
  func.func @transform_7(%arg0: i32) -> (i32, i32, i32) {
    %c0_i32 = arith.constant 0 : i32
    %c0_i32_0 = arith.constant 0 : i32
    %c0_i32_1 = arith.constant 0 : i32
    return %arg0, %c0_i32, %c0_i32_0 : i32, i32, i32
  }
}

</mosaic_0001>

<bundles_post_ra>
// kernel: decoder_block_forward.1
= control target key start
LH: loop header
LB: loop body
LE: loop exit
PB: predicated region body
PF: predicated region fallthrough
CT: control target
= control target key end

     0   :  { %v1605_v0 = vmov 0.0   ;;  %vm1606_vm0 = vmmov 0   ;;  %vm84_vm1 = vcmask 523264   ;;  %vm1143_vm2 = vcmask 1045504   ;;  %s2067_s1 = inlined_call_operand.vmem [shape: bf16[3,64,128], index: 1, kind: input, shape index: {}]   ;;  %s2068_s0 = inlined_call_operand.vmem [shape: f32[36,64], index: 0, kind: input, shape index: {}]   ;;  %s2069_s3 = inlined_call_operand.vmem [shape: bf16[3,128,128], index: 3, kind: input, shape index: {}]   ;;  %s2070_s2 = inlined_call_operand.vmem [shape: f32[1,128], index: 2, kind: input, shape index: {}]   ;;  %s2071_s5 = inlined_call_operand.vmem [shape: bf16[128,512], index: 5, kind: input, shape index: {}]   ;;  %s2072_s4 = inlined_call_operand.vmem [shape: f32[1,128], index: 4, kind: input, shape index: {}]   ;;  %s2073_s6 = inlined_call_operand.vmem [shape: f32[1,512], index: 6, kind: input, shape index: {}]   ;;  %s2074_s7 = inlined_call_operand.vmem [shape: f32[2,16,512], index: 7, kind: output, shape index: {}]  }
   0x1   :  { %1374 = vmatprep.subr.bf16.mxu0 %v1605_v0  ;;  %367 = vst [vmem:[#allocation2] sm:$0x1] %v1605_v0  ;;  %370 = vst [vmem:[#allocation2 + $0x11] sm:$0x1] %v1605_v0  ;;  %1394 = vmatprep.subr.bf16.mxu1 %v1605_v0  ;;  %v1521_v1 = vld [vmem:[%s2067_s1 + $0x38] sm:$0xff]   ;;  %v1523_v3 = vld [vmem:[%s2067_s1 + $0x30] sm:$0xff]  }
   0x2   :  { %371 = vst [vmem:[#allocation2 + $0x12] sm:$0x1] %v1605_v0  ;;  %375 = vst [vmem:[#allocation2 + $0x23] sm:$0x1] %v1605_v0  ;;  %v1522_v2 = vld [vmem:[%s2067_s1 + $0x18] sm:$0xff]   ;;  %1382 = vmatprep.mubr.msk.bf16.mxu0 %vm1606_vm0, %v1605_v0  ;;  %1402 = vmatprep.mubr.msk.bf16.mxu1 %vm1606_vm0, %v1605_v0  ;;  %v1524_v4 = vld [vmem:[%s2067_s1 + $0x10] sm:$0xff]  }
   0x3   :  { %1375 = vmatpush3.bf16.msra.mxu0 %v1521_v1  ;;  %1395 = vmatpush3.bf16.msra.mxu1 %v1522_v2  ;;  %v1525_v5 = vld [vmem:[%s2067_s1 + $0x28] sm:$0xff]   ;;  %v1527_v7 = vld [vmem:[%s2067_s1 + $0x20] sm:$0xff]   ;;  %v1529_v15 = vld [vmem:[%s2067_s1 + $0x58] sm:$0xff]  }
   0x4   :  { %1376 = vmatprep.subr.bf16.mxu0 %v1605_v0  ;;  %1396 = vmatprep.subr.bf16.mxu1 %v1605_v0  ;;  %v1526_v6 = vld [vmem:[%s2067_s1 + $0x8] sm:$0xff]   ;;  %v1528_v10 = vld [vmem:[%s2067_s1] sm:$0xff]   ;;  %v1530_v16 = vld [vmem:[%s2067_s1 + $0x50] sm:$0xff]  }
   0x5   :  { %v43_v8 = vld [vmem:[%s2068_s0 + $0x1] sm:$0xff]  ;;  %v44_v9 = vld [vmem:[%s2068_s0 + $0x9] sm:$0xff]  ;;  %v45_v17 = vld [vmem:[%s2068_s0 + $0x11] sm:$0xff] }
   0x6   :  { %v27_v11 = vld [vmem:[%s2068_s0] sm:$0xff]  ;;  %v28_v12 = vld [vmem:[%s2068_s0 + $0x8] sm:$0xff]  ;;  %v48_v13 = vpack.c.bf16 %v44_v9, %v43_v8  ;;  %v29_v19 = vld [vmem:[%s2068_s0 + $0x10] sm:$0xff] }
   0x7   :  { %1377 = vmatpush3.bf16.msra.mxu0 %v1523_v3  ;;  %1397 = vmatpush3.bf16.msra.mxu1 %v1524_v4  ;;  %v32_v14 = vpack.c.bf16 %v28_v12, %v27_v11  ;;  %v46_v18 = vld [vmem:[%s2068_s0 + $0x19] sm:$0xff]  ;;  %v1531_v23 = vld [vmem:[%s2067_s1 + $0x48] sm:$0xff]   ;;  %v47_v24 = vld [vmem:[%s2068_s0 + $0x21] sm:$0x3] }
   0x8   :  { %1378 = vmatprep.subr.bf16.mxu0 %v1605_v0  ;;  %1398 = vmatprep.subr.bf16.mxu1 %v1605_v0  ;;  %v30_v20 = vld [vmem:[%s2068_s0 + $0x18] sm:$0xff]  ;;  %v49_v21 = vpack.c.bf16 %v46_v18, %v45_v17  ;;  %v1532_v25 = vld [vmem:[%s2067_s1 + $0x40] sm:$0xff]   ;;  %v50_v27 = vpack.c.bf16 %v47_v24, %v47_v24  ;;  %v240_v30 = vld [vmem:[%s2068_s0 + $0xa] sm:$0xff] }
   0x9   :  { %v33_v22 = vpack.c.bf16 %v30_v20, %v29_v19  ;;  %v31_v26 = vld [vmem:[%s2068_s0 + $0x20] sm:$0x3]  ;;  %v239_v29 = vld [vmem:[%s2068_s0 + $0x2] sm:$0xff]  ;;  %v241_v32 = vld [vmem:[%s2068_s0 + $0x12] sm:$0xff] }
   0xa   :  { %v34_v28 = vpack.c.bf16 %v31_v26, %v31_v26  ;;  %v244_v31 = vpack.c.bf16 %v240_v30, %v239_v29  ;;  %v242_v33 = vld [vmem:[%s2068_s0 + $0x1a] sm:$0xff]  ;;  %v243_v35 = vld [vmem:[%s2068_s0 + $0x22] sm:$0x3]  ;;  %v1535_v38 = vld [vmem:[%s2069_s3 + $0x70] sm:$0xff]  }
   0xb   :  { %1379 = vmatpush3.bf16.msra.mxu0 %v1525_v5  ;;  %1399 = vmatpush3.bf16.msra.mxu1 %v1526_v6  ;;  %v245_v34 = vpack.c.bf16 %v242_v33, %v241_v32  ;;  %v246_v36 = vpack.c.bf16 %v243_v35, %v243_v35  ;;  %v1533_v37 = vld [vmem:[%s2069_s3 + $0x78] sm:$0xff]   ;;  %v1537_v39 = vld [vmem:[%s2069_s3 + $0x68] sm:$0xff]   ;;  %v1539_v41 = vld [vmem:[%s2069_s3 + $0x60] sm:$0xff]  }
   0xc   :  { %1380 = vmatprep.subr.bf16.mxu0 %v1605_v0  ;;  %1400 = vmatprep.subr.bf16.mxu1 %v1605_v0  ;;  %v1534_v40 = vld [vmem:[%s2069_s3 + $0x38] sm:$0xff]   ;;  %v1536_v42 = vld [vmem:[%s2069_s3 + $0x30] sm:$0xff]   ;;  %v1538_v44 = vld [vmem:[%s2069_s3 + $0x28] sm:$0xff]  }
   0xd   :  { %v1541_v43 = vld [vmem:[%s2069_s3 + $0x58] sm:$0xff]   ;;  %v1543_v45 = vld [vmem:[%s2069_s3 + $0x50] sm:$0xff]   ;;  %v1540_v46 = vld [vmem:[%s2069_s3 + $0x20] sm:$0xff]  }
   0xe   :  { %v1545_v47 = vld [vmem:[%s2069_s3 + $0x48] sm:$0xff]   ;;  %v1542_v48 = vld [vmem:[%s2069_s3 + $0x18] sm:$0xff]   ;;  %v1547_v49 = vld [vmem:[%s2069_s3 + $0x40] sm:$0xff]  }
   0xf   :  { %1381 = vmatpush3.bf16.msra.mxu0 %v1527_v7  ;;  %1401 = vmatpush3.bf16.msra.mxu1 %v1528_v10  ;;  %v1544_v50 = vld [vmem:[%s2069_s3 + $0x10] sm:$0xff]   ;;  %v1546_v51 = vld [vmem:[%s2069_s3 + $0x8] sm:$0xff]   ;;  %v1548_v52 = vld [vmem:[%s2069_s3] sm:$0xff]  }
  0x10   :  { %1414 = vmatprep.subr.bf16.mxu0 %v1605_v0  ;;  %1434 = vmatprep.subr.bf16.mxu1 %v1605_v0 }
  0x12   :  { %1383 = vmatmul.mubr.msk.bf16.vlgmr.msra.gmra.mxu0 %vm84_vm1, %v48_v13  ;;  %1403 = vmatmul.mubr.msk.bf16.vlgmr.msra.gmra.mxu1 %vm84_vm1, %v32_v14 }
  0x13   :  { %1415 = vmatpush3.bf16.msra.mxu0 %v1529_v15  ;;  %1386 = vmatprep.mubr.msk.bf16.mxu0 %vm1606_vm0, %v1605_v0 }
  0x14   :  { %1416 = vmatprep.subr.bf16.mxu0 %v1605_v0  ;;  %1406 = vmatprep.mubr.msk.bf16.mxu1 %vm1606_vm0, %v1605_v0 }
  0x15   :  { %1435 = vmatpush3.bf16.msra.mxu1 %v1533_v37 }
  0x16   :  { %1436 = vmatprep.subr.bf16.mxu1 %v1605_v0 }
  0x17   :  { %1417 = vmatpush3.bf16.msra.mxu0 %v1530_v16  ;;  %v1222_v16 = vld [vmem:[%s2070_s2] ss:$0 sm:$0xff] }
  0x18   :  { %1418 = vmatprep.subr.bf16.mxu0 %v1605_v0 }
  0x19   :  { %1437 = vmatpush3.bf16.msra.mxu1 %v1535_v38 }
  0x1a   :  { %1387 = vmatmul.mubr.msk.bf16.gmra.mxu0 %vm84_vm1, %v49_v21  ;;  %1407 = vmatmul.mubr.msk.bf16.gmra.mxu1 %vm84_vm1, %v33_v22 }
  0x1b   :  { %1419 = vmatpush3.bf16.msra.mxu0 %v1531_v23  ;;  %1390 = vmatprep.mubr.msk.bf16.mxu0 %vm1606_vm0, %v1605_v0 }
  0x1c   :  { %1410 = vmatprep.mubr.msk.bf16.mxu1 %vm1606_vm0, %v1605_v0  ;;  %1420 = vmatprep.subr.bf16.mxu0 %v1605_v0 }
  0x1d   :  { %1438 = vmatprep.subr.bf16.mxu1 %v1605_v0 }
  0x1e   :  { %1439 = vmatpush3.bf16.msra.mxu1 %v1537_v39  ;;  %v1550_v39 = vld [vmem:[%s2069_s3 + $0xb0] sm:$0xff]  }
  0x1f   :  { %1421 = vmatpush3.bf16.msra.mxu0 %v1532_v25  ;;  %1440 = vmatprep.subr.bf16.mxu1 %v1605_v0 }
  0x20   :  { %1462 = vmatprep.subr.bf16.mxu0 %v1605_v0 }
  0x22   :  { %1391 = vmatmul.mubr.msk.bf16.gmra.mxu0 %vm84_vm1, %v50_v27  ;;  %1411 = vmatmul.mubr.msk.bf16.gmra.mxu1 %vm84_vm1, %v34_v28 }
  0x23   :  { %1422 = vmatprep.mubr.msk.bf16.mxu0 %vm1606_vm0, %v1605_v0  ;;  %1450 = vmatprep.mubr.msk.bf16.mxu1 %vm1606_vm0, %v1605_v0 }
  0x24   :  { %1441 = vmatpush3.bf16.msra.mxu1 %v1539_v41 }
  0x25   :  { %1442 = vmatprep.subr.bf16.mxu1 %v1605_v0 }
  0x28   :  { %1443 = vmatpush3.bf16.msra.mxu1 %v1541_v43 }
  0x29   :  { %1444 = vmatprep.subr.bf16.mxu1 %v1605_v0 }
  0x2a   :  { %1423 = vmatmul.mubr.msk.bf16.vlgmr.msra.gmra.mxu0 %vm84_vm1, %v244_v31  ;;  %v1549_v31 = vld [vmem:[%s2069_s3 + $0xb8] sm:$0xff]  }
  0x2b   :  { %1426 = vmatprep.mubr.msk.bf16.mxu0 %vm1606_vm0, %v1605_v0  ;;  %1463 = vmatpush3.bf16.msra.mxu0 %v1534_v40 }
  0x2c   :  { %1464 = vmatprep.subr.bf16.mxu0 %v1605_v0  ;;  %1445 = vmatpush3.bf16.msra.mxu1 %v1543_v45 }
  0x2d   :  { %1446 = vmatprep.subr.bf16.mxu1 %v1605_v0 }
  0x2f   :  { %1465 = vmatpush3.bf16.msra.mxu0 %v1536_v42 }
  0x30   :  { %1466 = vmatprep.subr.bf16.mxu0 %v1605_v0  ;;  %1447 = vmatpush3.bf16.msra.mxu1 %v1545_v47 }
  0x31   :  { %1448 = vmatprep.subr.bf16.mxu1 %v1605_v0 }
  0x32   :  { %1427 = vmatmul.mubr.msk.bf16.gmra.mxu0 %vm84_vm1, %v245_v34 }
  0x33   :  { %1430 = vmatprep.mubr.msk.bf16.mxu0 %vm1606_vm0, %v1605_v0  ;;  %1467 = vmatpush3.bf16.msra.mxu0 %v1538_v44 }
  0x34   :  { %1468 = vmatprep.subr.bf16.mxu0 %v1605_v0  ;;  %1449 = vmatpush3.bf16.msra.mxu1 %v1547_v49 }
  0x35   :  { %1490 = vmatprep.subr.bf16.mxu1 %v1605_v0 }
  0x37   :  { %1469 = vmatpush3.bf16.msra.mxu0 %v1540_v46 }
  0x38   :  { %1470 = vmatprep.subr.bf16.mxu0 %v1605_v0 }
  0x3a   :  { %1431 = vmatmul.mubr.msk.bf16.gmra.mxu0 %vm84_vm1, %v246_v36 }
  0x3b   :  { %1478 = vmatprep.mubr.msk.bf16.mxu0 %vm1606_vm0, %v1605_v0  ;;  %1471 = vmatpush3.bf16.msra.mxu0 %v1542_v48  ;;  %v1551_v48 = vld [vmem:[%s2069_s3 + $0xa8] sm:$0xff]  }
  0x3c   :  { %1472 = vmatprep.subr.bf16.mxu0 %v1605_v0 }
  0x3f   :  { %1473 = vmatpush3.bf16.msra.mxu0 %v1544_v50 }
  0x40   :  { %1474 = vmatprep.subr.bf16.mxu0 %v1605_v0 }
  0x43   :  { %1475 = vmatpush3.bf16.msra.mxu0 %v1546_v51 }
  0x44   :  { %1476 = vmatprep.subr.bf16.mxu0 %v1605_v0 }
  0x47   :  { %1477 = vmatpush3.bf16.msra.mxu0 %v1548_v52 }
  0xd2   :  { %v128_v53 = vpop.f32.mrf.mxu0  ;;  %v217_v54 = vpop.f32.mrf.mxu1 }
  0xd3   :  { %v218_v13 = vadd.f32 %v217_v54, %v128_v53 }
  0xd4   :  { %v1384_v55 = vpop.f32.mrf.mxu0  ;;  %v1404_v56 = vpop.f32.mrf.mxu1 }
  0xd5   :  { %v1552_v55 = vld [vmem:[%s2069_s3 + $0xa0] sm:$0xff]  }
  0xd6   :  { %v131_v57 = vpop.f32.mrf.mxu0  ;;  %v220_v58 = vpop.f32.mrf.mxu1 }
  0xd7   :  { %v221_v19 = vadd.f32 %v220_v58, %v131_v57 }
  0xd8   :  { %v1385_v59 = vpop.f32.mrf.mxu0  ;;  %v1405_v60 = vpop.f32.mrf.mxu1 }
  0xd9   :  { %v1553_v59 = vld [vmem:[%s2069_s3 + $0x98] sm:$0xff]  }
  0xda   :  { %v136_v61 = vpop.f32.mrf.mxu0  ;;  %v225_v62 = vpop.f32.mrf.mxu1 }
  0xdb   :  { %v226_v25 = vadd.f32 %v225_v62, %v136_v61  ;;  %v1554_v62 = vld [vmem:[%s2069_s3 + $0x90] sm:$0xff]  }
  0xdc   :  { %v1388_v63 = vpop.f32.mrf.mxu0  ;;  %v1408_v1 = vpop.f32.mrf.mxu1 }
  0xde   :  { %v139_v2 = vpop.f32.mrf.mxu0  ;;  %v228_v3 = vpop.f32.mrf.mxu1 }
  0xdf   :  { %v229_v32 = vadd.f32 %v228_v3, %v139_v2  ;;  %v1555_v2 = vld [vmem:[%s2069_s3 + $0x88] sm:$0xff]  }
  0xe0   :  { %v1389_v4 = vpop.f32.mrf.mxu0  ;;  %v1409_v5 = vpop.f32.mrf.mxu1 }
  0xe1   :  { %v1556_v4 = vld [vmem:[%s2069_s3 + $0x80] sm:$0xff]  }
  0xe2   :  { %v144_v6 = vpop.f32.mrf.mxu0  ;;  %v233_v7 = vpop.f32.mrf.mxu1 }
  0xe3   :  { %v234_v40 = vadd.f32 %v233_v7, %v144_v6 }
  0xe4   :  { %v1392_v8 = vpop.f32.mrf.mxu0  ;;  %v1412_v9 = vpop.f32.mrf.mxu1 }
  0xe6   :  { %v147_v10 = vpop.f32.mrf.mxu0  ;;  %v236_v11 = vpop.f32.mrf.mxu1 }
  0xe8   :  { %v1393_v12 = vpop.f32.mrf.mxu0  ;;  %v1413_v14 = vpop.f32.mrf.mxu1 }
  0xe9   :  { %v1557_v14 = vld [vmem:[%s2071_s5 + $0xe0] ss:$16 sps:$4 sm:$0xff]  }
  0xea   :  { %v323_v15 = vpop.f32.mrf.mxu0 }
  0xeb   :  { %v345_v17 = vadd.f32 %v323_v15, %v218_v13  ;;  %v1559_v13 = vld [vmem:[%s2071_s5 + $0xe4] ss:$16 sps:$4 sm:$0xff]   ;;  %v1560_v15 = vld [vmem:[%s2071_s5 + $0xe8] ss:$16 sps:$4 sm:$0xff]  }
  0xec   :  { %v1424_v18 = vpop.f32.mrf.mxu0  ;;  %1001 = vmatprep.subr.bf16.mxu0 %v1559_v13 }
  0xed   :  { %v357_v20 = vadd.f32 %v1222_v16, %v345_v17  ;;  %v1568_v17 = vld [vmem:[%s2071_s5 + $0xcc] ss:$16 sps:$4 sm:$0xff]   ;;  %v1563_v18 = vld [vmem:[%s2071_s5 + $0xc0] ss:$16 sps:$4 sm:$0xff]  }
  0xee   :  { %v326_v21 = vpop.f32.mrf.mxu0 }
  0xef   :  { %v362_v22 = vmax.f32 %v357_v20, 0.0  ;;  %v346_v23 = vadd.f32 %v326_v21, %v221_v19  ;;  %v1566_v19 = vld [vmem:[%s2071_s5 + $0xc8] ss:$16 sps:$4 sm:$0xff]   ;;  %v1571_v20 = vld [vmem:[%s2071_s5 + $0xa4] ss:$16 sps:$4 sm:$0xff]  }
  0xf0   :  { %v1425_v24 = vpop.f32.mrf.mxu0  ;;  %v1574_v21 = vld [vmem:[%s2071_s5 + $0xac] ss:$16 sps:$4 sm:$0xff]  }
  0xf1   :  { %368 = vst [vmem:[#allocation2 + $0x1] sm:$0xff] %v362_v22  ;;  %v358_v26 = vadd.f32 %v1222_v16, %v346_v23  ;;  %v1572_v23 = vld [vmem:[%s2071_s5 + $0xa8] ss:$16 sps:$4 sm:$0xff]   ;;  %v1577_v24 = vld [vmem:[%s2071_s5 + $0x84] ss:$16 sps:$4 sm:$0xff]  }
  0xf2   :  { %v331_v27 = vpop.f32.mrf.mxu0 }
  0xf3   :  { %v363_v28 = vmax.f32 %v358_v26, 0.0  ;;  %v347_v29 = vadd.f32 %v331_v27, %v226_v25  ;;  %v1580_v25 = vld [vmem:[%s2071_s5 + $0x8c] ss:$16 sps:$4 sm:$0xff]   ;;  %v1575_v26 = vld [vmem:[%s2071_s5 + $0x80] ss:$16 sps:$4 sm:$0xff]  }
  0xf4   :  { %v1428_v30 = vpop.f32.mrf.mxu0  ;;  %v1578_v27 = vld [vmem:[%s2071_s5 + $0x88] ss:$16 sps:$4 sm:$0xff]  }
  0xf5   :  { %369 = vst [vmem:[#allocation2 + $0x9] sm:$0xff] %v363_v28  ;;  %v359_v33 = vadd.f32 %v1222_v16, %v347_v29  ;;  %v405_v34 = vpack.c.bf16 %v363_v28, %v362_v22  ;;  %v1569_v22 = vld [vmem:[%s2071_s5 + $0xa0] ss:$16 sps:$4 sm:$0xff]   ;;  %v1583_v28 = vld [vmem:[%s2071_s5 + $0x64] ss:$16 sps:$4 sm:$0xff]  }
  0xf6   :  { %v334_v35 = vpop.f32.mrf.mxu0  ;;  %v1586_v29 = vld [vmem:[%s2071_s5 + $0x6c] ss:$16 sps:$4 sm:$0xff]   ;;  %v1581_v30 = vld [vmem:[%s2071_s5 + $0x60] ss:$16 sps:$4 sm:$0xff]  }
  0xf7   :  { %v364_v36 = vmax.f32 %v359_v33, 0.0  ;;  %v348_v37 = vadd.f32 %v334_v35, %v229_v32  ;;  %1451 = vmatmul.mubr.bf16.vlgmr.msra.gmra.mxu1 %v405_v34  ;;  %v1589_v32 = vld [vmem:[%s2071_s5 + $0x44] ss:$16 sps:$4 sm:$0xff]   ;;  %v1592_v33 = vld [vmem:[%s2071_s5 + $0x4c] ss:$16 sps:$4 sm:$0xff]  }
  0xf8   :  { %v1429_v38 = vpop.f32.mrf.mxu0  ;;  %1491 = vmatpush3.bf16.msra.mxu1 %v1549_v31  ;;  %1454 = vmatprep.mubr.msk.bf16.mxu1 %vm1606_vm0, %v1605_v0  ;;  %v376_v45 = vld [vmem:[#allocation2] sm:$0xff]  ;;  %v1584_v31 = vld [vmem:[%s2071_s5 + $0x68] ss:$16 sps:$4 sm:$0xff]  }
  0xf9   :  { %372 = vst [vmem:[#allocation2 + $0x11] sm:$0xfc] %v364_v36  ;;  %v360_v41 = vadd.f32 %v1222_v16, %v348_v37  ;;  %1492 = vmatprep.subr.bf16.mxu1 %v1605_v0  ;;  %v1587_v34 = vld [vmem:[%s2071_s5 + $0x40] ss:$16 sps:$4 sm:$0xff]   ;;  %v1590_v35 = vld [vmem:[%s2071_s5 + $0x48] ss:$16 sps:$4 sm:$0xff]  }
  0xfa   :  { %v339_v42 = vpop.f32.mrf.mxu0  ;;  %v1595_v36 = vld [vmem:[%s2071_s5 + $0x24] ss:$16 sps:$4 sm:$0xff]   ;;  %v1598_v37 = vld [vmem:[%s2071_s5 + $0x2c] ss:$16 sps:$4 sm:$0xff]   ;;  %v1593_v38 = vld [vmem:[%s2071_s5 + $0x20] ss:$16 sps:$4 sm:$0xff]  }
  0xfb   :  { %v365_v43 = vmax.f32 %v360_v41, 0.0  ;;  %v349_v44 = vadd.f32 %v339_v42, %v234_v40  ;;  %v1601_v40 = vld [vmem:[%s2071_s5 + $0x4] ss:$16 sps:$4 sm:$0xff]   ;;  %v1604_v41 = vld [vmem:[%s2071_s5 + $0xc] ss:$16 sps:$4 sm:$0xff]  }
  0xfc   :  { %v377_v46 = vld [vmem:[#allocation2 + $0x8] sm:$0xff]  ;;  %v1432_v47 = vpop.f32.mrf.mxu0  ;;  %1493 = vmatpush3.bf16.msra.mxu1 %v1550_v39  ;;  %v1599_v42 = vld [vmem:[%s2071_s5] ss:$16 sps:$4 sm:$0xff]  }
  0xfd   :  { %373 = vst [vmem:[#allocation2 + $0x19] sm:$0xff] %v365_v43  ;;  %v361_v49 = vadd.f32 %v1222_v16, %v349_v44  ;;  %v381_v50 = vpack.c.bf16 %v377_v46, %v376_v45  ;;  %1494 = vmatprep.subr.bf16.mxu1 %v1605_v0  ;;  %v633_v5 = vld [vmem:[#allocation2 + $0x2] sm:$0xff]  ;;  %v634_v6 = vld [vmem:[#allocation2 + $0xa] sm:$0xff]  ;;  %v1607_v44 = vmov 0  }
  0xfe   :  { %v342_v51 = vpop.f32.mrf.mxu0  ;;  %v638_v7 = vpack.c.bf16 %v634_v6, %v633_v5  ;;  %v1565_v16 = vld [vmem:[%s2071_s5 + $0xc4] ss:$16 sps:$4 sm:$0xff]   ;;  %v1596_v39 = vld [vmem:[%s2071_s5 + $0x28] ss:$16 sps:$4 sm:$0xff]  }
  0xff   :  { %v366_v52 = vmax.f32 %v361_v49, 0.0  ;;  %1479 = vmatmul.mubr.bf16.vlgmr.msra.gmra.mxu0 %v381_v50 }
 0x100   :  { %v1433_v53 = vpop.f32.mrf.mxu0  ;;  %1482 = vmatprep.mubr.msk.bf16.mxu0 %vm1606_vm0, %v1605_v0  ;;  %v402_v54 = vld [vmem:[#allocation2 + $0x11] sm:$0xff]  ;;  %1495 = vmatpush3.bf16.msra.mxu1 %v1551_v48 }
 0x101   :  { %374 = vst [vmem:[#allocation2 + $0x21] sm:$0x3] %v366_v52  ;;  %v406_v56 = vpack.c.bf16 %v365_v43, %v402_v54  ;;  %1496 = vmatprep.subr.bf16.mxu1 %v1605_v0  ;;  %v378_v57 = vld [vmem:[#allocation2 + $0x10] sm:$0xff]  ;;  %1002 = vmatpush1.bf16.msra.mxu0 %v1557_v14  ;;  %v1602_v43 = vld [vmem:[%s2071_s5 + $0x8] ss:$16 sps:$4 sm:$0xff]  }
 0x102   :  { %1003 = vmatprep.subr.bf16.mxu0 %v1565_v16 }
 0x103   :  { %1455 = vmatmul.mubr.bf16.gmra.mxu1 %v406_v56 }
 0x104   :  { %v379_v58 = vld [vmem:[#allocation2 + $0x18] sm:$0xff]  ;;  %1497 = vmatpush3.bf16.msra.mxu1 %v1552_v55  ;;  %1458 = vmatprep.mubr.msk.bf16.mxu1 %vm1606_vm0, %v1605_v0 }
 0x105   :  { %v382_v60 = vpack.c.bf16 %v379_v58, %v378_v57  ;;  %1498 = vmatprep.subr.bf16.mxu1 %v1605_v0  ;;  %v635_v9 = vld [vmem:[#allocation2 + $0x12] sm:$0xff]  ;;  %1004 = vmatpush1.bf16.msra.mxu0 %v1563_v18 }
 0x106   :  { %1005 = vmatprep.subr.bf16.mxu0 %v1571_v20 }
 0x107   :  { %1483 = vmatmul.mubr.bf16.gmra.mxu0 %v382_v60 }
 0x108   :  { %1486 = vmatprep.mubr.msk.bf16.mxu0 %vm1606_vm0, %v1605_v0  ;;  %v404_v61 = vld [vmem:[#allocation2 + $0x21] sm:$0x3]  ;;  %1499 = vmatpush3.bf16.msra.mxu1 %v1553_v59 }
 0x109   :  { %v407_v63 = vpack.c.bf16 %v404_v61, %v404_v61  ;;  %1500 = vmatprep.subr.bf16.mxu1 %v1605_v0  ;;  %v380_v1 = vld [vmem:[#allocation2 + $0x20] sm:$0x3]  ;;  %v637_v11 = vld [vmem:[#allocation2 + $0x22] sm:$0x3]  ;;  %1006 = vmatpush1.bf16.msra.mxu0 %v1569_v22 }
 0x10a   :  { %v383_v3 = vpack.c.bf16 %v380_v1, %v380_v1  ;;  %v636_v8 = vld [vmem:[#allocation2 + $0x1a] sm:$0xff]  ;;  %v640_v12 = vpack.c.bf16 %v637_v11, %v637_v11  ;;  %1007 = vmatprep.subr.bf16.mxu0 %v1577_v24 }
 0x10b   :  { %1459 = vmatmul.mubr.bf16.gmra.mxu1 %v407_v63  ;;  %v639_v10 = vpack.c.bf16 %v636_v8, %v635_v9  ;;  %v1279_v9 = vld [vmem:[%s2072_s4] ss:$0 sm:$0xff] }
 0x10c   :  { %1501 = vmatpush3.bf16.msra.mxu1 %v1554_v62  ;;  %1506 = vmatprep.mubr.msk.bf16.mxu1 %vm1606_vm0, %v1605_v0 }
 0x10d   :  { %1502 = vmatprep.subr.bf16.mxu1 %v1605_v0  ;;  %1008 = vmatpush1.bf16.msra.mxu0 %v1575_v26 }
 0x10e   :  { %1009 = vmatprep.subr.bf16.mxu0 %v1583_v28 }
 0x10f   :  { %1487 = vmatmul.mubr.bf16.gmra.mxu0 %v383_v3 }
 0x110   :  { %1503 = vmatpush3.bf16.msra.mxu1 %v1555_v2  ;;  %1033 = vmatprep.mubr.bf16.mxu0 %v1607_v44 }
 0x111   :  { %1504 = vmatprep.subr.bf16.mxu1 %v1605_v0  ;;  %1010 = vmatpush1.bf16.msra.mxu0 %v1581_v30 }
 0x112   :  { %1011 = vmatprep.subr.bf16.mxu0 %v1589_v32 }
 0x114   :  { %1505 = vmatpush3.bf16.msra.mxu1 %v1556_v4 }
 0x115   :  { %1012 = vmatpush1.bf16.msra.mxu0 %v1587_v34 }
 0x116   :  { %1013 = vmatprep.subr.bf16.mxu0 %v1595_v36 }
 0x117   :  { %1507 = vmatmul.mubr.bf16.vlgmr.msra.gmra.mxu1 %v638_v7 }
 0x118   :  { %1510 = vmatprep.mubr.msk.bf16.mxu1 %vm1606_vm0, %v1605_v0 }
 0x119   :  { %1014 = vmatpush1.bf16.msra.mxu0 %v1593_v38 }
 0x11a   :  { %1015 = vmatprep.subr.bf16.mxu0 %v1601_v40 }
 0x11d   :  { %1016 = vmatpush1.bf16.msra.mxu0 %v1599_v42 }
 0x11f   :  { %1511 = vmatmul.mubr.bf16.gmra.mxu1 %v639_v10 }
 0x120   :  { %1514 = vmatprep.mubr.msk.bf16.mxu1 %vm1606_vm0, %v1605_v0  ;;  %v1562_v0 = vld [vmem:[%s2071_s5 + $0xec] ss:$16 sps:$4 sm:$0xff]  }
 0x121   :  { %1062 = vmatprep.subr.bf16.mxu1 %v1562_v0 }
 0x122   :  { %1063 = vmatpush1.bf16.msra.mxu1 %v1560_v15 }
 0x123   :  { %1064 = vmatprep.subr.bf16.mxu1 %v1568_v17 }
 0x126   :  { %1065 = vmatpush1.bf16.msra.mxu1 %v1566_v19 }
 0x127   :  { %1515 = vmatmul.mubr.bf16.gmra.mxu1 %v640_v12  ;;  %1066 = vmatprep.subr.bf16.mxu1 %v1574_v21 }
 0x128   :  { %1094 = vmatprep.mubr.bf16.mxu1 %v1607_v44 }
 0x12a   :  { %1067 = vmatpush1.bf16.msra.mxu1 %v1572_v23 }
 0x12b   :  { %1068 = vmatprep.subr.bf16.mxu1 %v1580_v25 }
 0x12e   :  { %1069 = vmatpush1.bf16.msra.mxu1 %v1578_v27 }
 0x12f   :  { %1070 = vmatprep.subr.bf16.mxu1 %v1586_v29 }
 0x132   :  { %1071 = vmatpush1.bf16.msra.mxu1 %v1584_v31 }
 0x133   :  { %1072 = vmatprep.subr.bf16.mxu1 %v1592_v33 }
 0x136   :  { %1073 = vmatpush1.bf16.msra.mxu1 %v1590_v35 }
 0x137   :  { %1074 = vmatprep.subr.bf16.mxu1 %v1598_v37 }
 0x13a   :  { %1075 = vmatpush1.bf16.msra.mxu1 %v1596_v39 }
 0x13b   :  { %1076 = vmatprep.subr.bf16.mxu1 %v1604_v41  ;;  %v821_v41 = vlaneseq }
 0x13d   :  { %v822_v42 = vshrl.u32 %v821_v41, 7 }
 0x13e   :  { %1077 = vmatpush1.bf16.msra.mxu1 %v1602_v43 }
 0x13f   :  { %v823_v43 = vsub.s32 0, %v822_v42 }
 0x1b7   :  { %v507_v45 = vpop.f32.mrf.mxu1 }
 0x1b9   :  { %v1452_v46 = vpop.f32.mrf.mxu1 }
 0x1ba   :  { %v819_v46 = vld [vmem:[%s2073_s6] sm:$0xf] }
 0x1bb   :  { %v510_v47 = vpop.f32.mrf.mxu1 }
 0x1bd   :  { %v1453_v48 = vpop.f32.mrf.mxu1 }
 0x1be   :  { %v835_v48 = vsub.s32 3, %v822_v42 }
 0x1bf   :  { %v611_v49 = vpop.f32.mrf.mxu0 }
 0x1c0   :  { %v612_v6 = vadd.f32 %v611_v49, %v507_v45  ;;  %v831_v45 = vsub.s32 2, %v822_v42  ;;  %v824_v49 = vrot.slane %v819_v46, %v823_v43 }
 0x1c1   :  { %v1480_v50 = vpop.f32.mrf.mxu0 }
 0x1c2   :  { %v832_v50 = vrot.slane %v819_v46, %v831_v45 }
 0x1c3   :  { %v614_v51 = vpop.f32.mrf.mxu0  ;;  %v515_v52 = vpop.f32.mrf.mxu1 }
 0x1c4   :  { %v615_v11 = vadd.f32 %v614_v51, %v510_v47  ;;  %v827_v47 = vsub.s32 1, %v822_v42 }
 0x1c5   :  { %v1481_v53 = vpop.f32.mrf.mxu0  ;;  %v1456_v54 = vpop.f32.mrf.mxu1 }
 0x1c6   :  { %v1997_v51 = vrot.slane %v819_v46, %v827_v47 }
 0x1c7   :  { %v619_v55 = vpop.f32.mrf.mxu0  ;;  %v518_v56 = vpop.f32.mrf.mxu1 }
 0x1c8   :  { %v620_v0 = vadd.f32 %v619_v55, %v515_v52  ;;  %v1999_v52 = vrot.slane %v819_v46, %v835_v48 }
 0x1c9   :  { %v1484_v57 = vpop.f32.mrf.mxu0  ;;  %v1457_v58 = vpop.f32.mrf.mxu1 }
 0x1cb   :  { %v622_v59 = vpop.f32.mrf.mxu0  ;;  %v523_v60 = vpop.f32.mrf.mxu1 }
 0x1cc   :  { %v623_v22 = vadd.f32 %v622_v59, %v518_v56 }
 0x1cd   :  { %v1485_v61 = vpop.f32.mrf.mxu0  ;;  %v1460_v62 = vpop.f32.mrf.mxu1 }
 0x1cf   :  { %v627_v63 = vpop.f32.mrf.mxu0  ;;  %v526_v1 = vpop.f32.mrf.mxu1 }
 0x1d0   :  { %v628_v28 = vadd.f32 %v627_v63, %v523_v60 }
 0x1d1   :  { %v1488_v2 = vpop.f32.mrf.mxu0  ;;  %v1461_v3 = vpop.f32.mrf.mxu1 }
 0x1d3   :  { %v630_v4 = vpop.f32.mrf.mxu0 }
 0x1d5   :  { %v1489_v5 = vpop.f32.mrf.mxu0 }
 0x1d7   :  { %v740_v7 = vpop.f32.mrf.mxu1 }
 0x1d8   :  { %v762_v8 = vadd.f32 %v740_v7, %v612_v6 }
 0x1d9   :  { %v1508_v10 = vpop.f32.mrf.mxu1 }
 0x1da   :  { %v774_v13 = vadd.f32 %v1279_v9, %v762_v8 }
 0x1db   :  { %v743_v12 = vpop.f32.mrf.mxu1 }
 0x1dc   :  { %v763_v14 = vadd.f32 %v743_v12, %v615_v11  ;;  %v779_v18 = vmax.f32 %v774_v13, 0.0 }
 0x1dd   :  { %v1509_v15 = vpop.f32.mrf.mxu1 }
 0x1de   :  { %v775_v16 = vadd.f32 %v1279_v9, %v763_v14 }
 0x1df   :  { %v748_v17 = vpop.f32.mrf.mxu1 }
 0x1e0   :  { %v780_v19 = vmax.f32 %v775_v16, 0.0  ;;  %v764_v20 = vadd.f32 %v748_v17, %v620_v0 }
 0x1e1   :  { %v1512_v21 = vpop.f32.mrf.mxu1 }
 0x1e2   :  { %v784_v23 = vpack.c.bf16 %v780_v19, %v779_v18  ;;  %v776_v25 = vadd.f32 %v1279_v9, %v764_v20 }
 0x1e3   :  { %v751_v24 = vpop.f32.mrf.mxu1 }
 0x1e4   :  { %v765_v26 = vadd.f32 %v751_v24, %v623_v22  ;;  %1034 = vmatmul.mubr.bf16.vlgmr.msra.gmra.mxu0 %v784_v23  ;;  %1095 = vmatmul.mubr.bf16.vlgmr.msra.gmra.mxu1 %v784_v23  ;;  %v781_v31 = vmax.f32 %v776_v25, 0.0 }
 0x1e5   :  { %v1513_v27 = vpop.f32.mrf.mxu1  ;;  %1043 = vmatprep.mubr.bf16.mxu0 %v1607_v44  ;;  %1104 = vmatprep.mubr.bf16.mxu1 %v1607_v44 }
 0x1e6   :  { %v777_v29 = vadd.f32 %v1279_v9, %v765_v26 }
 0x1e7   :  { %v756_v30 = vpop.f32.mrf.mxu1 }
 0x1e8   :  { %v782_v32 = vmax.f32 %v777_v29, 0.0  ;;  %v766_v33 = vadd.f32 %v756_v30, %v628_v28 }
 0x1e9   :  { %v1516_v34 = vpop.f32.mrf.mxu1 }
 0x1ea   :  { %v778_v35 = vadd.f32 %v1279_v9, %v766_v33  ;;  %v785_v36 = vpack.c.bf16 %v782_v32, %v781_v31 }
 0x1eb   :  { %v759_v37 = vpop.f32.mrf.mxu1 }
 0x1ec   :  { %1044 = vmatmul.mubr.bf16.gmra.mxu0 %v785_v36  ;;  %1105 = vmatmul.mubr.bf16.gmra.mxu1 %v785_v36  ;;  %v783_v39 = vmax.f32 %v778_v35, 0.0 }
 0x1ed   :  { %v1517_v38 = vpop.f32.mrf.mxu1  ;;  %1053 = vmatprep.mubr.bf16.mxu0 %v1607_v44  ;;  %1114 = vmatprep.mubr.bf16.mxu1 %v1607_v44 }
 0x1ee   :  { %v786_v40 = vpack.c.bf16 %v783_v39, %v783_v39 }
 0x1f4   :  { %1054 = vmatmul.mubr.bf16.gmra.mxu0 %v786_v40  ;;  %1115 = vmatmul.mubr.bf16.gmra.mxu1 %v786_v40 }
 0x2a4   :  { %v1035_v44 = vpop.f32.mrf.mxu0  ;;  %v1096_v53 = vpop.f32.mrf.mxu1 }
 0x2a5   :  { %v1036_v54 = vadd.f32 %v1035_v44, %v824_v49  ;;  %v1097_v55 = vadd.f32 %v1096_v53, %v832_v50 }
 0x2a6   :  { %v1037_v56 = vpop.f32.mrf.mxu0  ;;  %v1098_v57 = vpop.f32.mrf.mxu1 }
 0x2a7   :  { %1123 = vst [vmem:[%s2074_s7] sm:$0xff] %v1036_v54  ;;  %1125 = vst [vmem:[%s2074_s7 + $0x10] sm:$0xff] %v1097_v55  ;;  %v1038_v58 = vadd.f32 %v1037_v56, %v1997_v51  ;;  %v1099_v59 = vadd.f32 %v1098_v57, %v1999_v52 }
 0x2a8   :  { %v1039_v60 = vpop.f32.mrf.mxu0  ;;  %v1100_v61 = vpop.f32.mrf.mxu1 }
 0x2a9   :  { %1124 = vst [vmem:[%s2074_s7 + $0x8] sm:$0xff] %v1038_v58  ;;  %1126 = vst [vmem:[%s2074_s7 + $0x18] sm:$0xff] %v1099_v59  ;;  %v1040_v62 = vadd.f32 %v1039_v60, %v824_v49  ;;  %v1101_v63 = vadd.f32 %v1100_v61, %v832_v50 }
 0x2aa   :  { %v1041_v1 = vpop.f32.mrf.mxu0  ;;  %v1102_v2 = vpop.f32.mrf.mxu1 }
 0x2ab   :  { %1127 = vst [vmem:[%s2074_s7 + $0x20] sm:$0xff] %v1040_v62  ;;  %1129 = vst [vmem:[%s2074_s7 + $0x30] sm:$0xff] %v1101_v63  ;;  %v1042_v3 = vadd.f32 %v1041_v1, %v1997_v51  ;;  %v1103_v4 = vadd.f32 %v1102_v2, %v1999_v52 }
 0x2ac   :  { %v1045_v5 = vpop.f32.mrf.mxu0  ;;  %v1106_v6 = vpop.f32.mrf.mxu1 }
 0x2ad   :  { %1128 = vst [vmem:[%s2074_s7 + $0x28] sm:$0xff] %v1042_v3  ;;  %1130 = vst [vmem:[%s2074_s7 + $0x38] sm:$0xff] %v1103_v4  ;;  %v1046_v7 = vadd.f32 %v1045_v5, %v824_v49  ;;  %v1107_v8 = vadd.f32 %v1106_v6, %v832_v50 }
 0x2ae   :  { %v1047_v9 = vpop.f32.mrf.mxu0  ;;  %v1108_v10 = vpop.f32.mrf.mxu1 }
 0x2af   :  { %v1048_v11 = vadd.f32 %v1047_v9, %v1997_v51  ;;  %v1109_v12 = vadd.f32 %v1108_v10, %v1999_v52  ;;  %v1144_v16 = vrot.slane %v1046_v7, 2  ;;  %v1150_v17 = vrot.slane %v1107_v8, 2 }
 0x2b0   :  { %v1049_v13 = vpop.f32.mrf.mxu0  ;;  %v1110_v14 = vpop.f32.mrf.mxu1 }
 0x2b1   :  { %v1050_v15 = vadd.f32 %v1049_v13, %v824_v49  ;;  %v1111_v0 = vadd.f32 %v1110_v14, %v832_v50  ;;  %v1147_v24 = vrot.slane %v1048_v11, 2  ;;  %v1153_v25 = vrot.slane %v1109_v12, 2 }
 0x2b2   :  { %v1051_v18 = vpop.f32.mrf.mxu0  ;;  %v1112_v19 = vpop.f32.mrf.mxu1 }
 0x2b3   :  { %v1145_v20 = vrot.slane %v1050_v15, 2  ;;  %v1151_v21 = vrot.slane %v1111_v0, 2  ;;  %v1052_v22 = vadd.f32 %v1051_v18, %v1997_v51  ;;  %v1113_v23 = vadd.f32 %v1112_v19, %v1999_v52 }
 0x2b4   :  { %v1055_v26 = vpop.f32.mrf.mxu0  ;;  %v1116_v27 = vpop.f32.mrf.mxu1 }
 0x2b5   :  { %v1146_v28 = vsel %vm1143_vm2, %v1144_v16, %v1145_v20  ;;  %v1152_v29 = vsel %vm1143_vm2, %v1150_v17, %v1151_v21  ;;  %v1148_v30 = vrot.slane %v1052_v22, 2  ;;  %v1154_v31 = vrot.slane %v1113_v23, 2 }
 0x2b6   :  { %1312 = vst [vmem:[%s2074_s7 + $0x40] sm:$0xff] %v1146_v28  ;;  %1314 = vst [vmem:[%s2074_s7 + $0x50] sm:$0xff] %v1152_v29  ;;  %v1056_v32 = vadd.f32 %v1055_v26, %v824_v49  ;;  %v1117_v33 = vadd.f32 %v1116_v27, %v832_v50  ;;  %v1057_v34 = vpop.f32.mrf.mxu0  ;;  %v1118_v35 = vpop.f32.mrf.mxu1 }
 0x2b7   :  { %v1149_v36 = vsel %vm1143_vm2, %v1147_v24, %v1148_v30  ;;  %v1155_v37 = vsel %vm1143_vm2, %v1153_v25, %v1154_v31  ;;  %v1058_v38 = vadd.f32 %v1057_v34, %v1997_v51  ;;  %v1119_v39 = vadd.f32 %v1118_v35, %v1999_v52 }
 0x2b8   :  { %1313 = vst [vmem:[%s2074_s7 + $0x48] sm:$0xff] %v1149_v36  ;;  %1315 = vst [vmem:[%s2074_s7 + $0x58] sm:$0xff] %v1155_v37  ;;  %v1156_v40 = vrot.slane %v1056_v32, 2  ;;  %v1160_v41 = vrot.slane %v1117_v33, 2  ;;  %v1059_v42 = vpop.f32.mrf.mxu0  ;;  %v1120_v43 = vpop.f32.mrf.mxu1 }
 0x2b9   :  { %v1158_v45 = vrot.slane %v1058_v38, 2  ;;  %v1162_v46 = vrot.slane %v1119_v39, 2 }
 0x2ba   :  { %v1157_v47 = vsel %vm1143_vm2, %v1145_v20, %v1156_v40  ;;  %v1161_v48 = vsel %vm1143_vm2, %v1151_v21, %v1160_v41  ;;  %v1060_v49 = vpop.f32.mrf.mxu0  ;;  %v1121_v50 = vpop.f32.mrf.mxu1 }
 0x2bb   :  { %1316 = vst [vmem:[%s2074_s7 + $0x60] sm:$0xff] %v1157_v47  ;;  %1318 = vst [vmem:[%s2074_s7 + $0x70] sm:$0xff] %v1161_v48  ;;  %v1159_v51 = vsel %vm1143_vm2, %v1148_v30, %v1158_v45  ;;  %v1163_v52 = vsel %vm1143_vm2, %v1154_v31, %v1162_v46 }
 0x2bc   :  { %1317 = vst [vmem:[%s2074_s7 + $0x68] sm:$0xff] %v1159_v51  ;;  %1319 = vst [vmem:[%s2074_s7 + $0x78] sm:$0xff] %v1163_v52 }

</bundles_post_ra>
